<compile_context>
chip_gen: v7x
topology: tpu7x:2x2x1
jax: 0.10.0
libtpu: 0.0.40
codegen_flags: <defaults>
</compile_context>

<pallas_src>
import math

import jax
import jax.numpy as jnp
from jax.experimental import pallas as pl
from jax.experimental.pallas import tpu as pltpu


def _round_up(x: int, m: int) -> int:
    return ((x + m - 1) // m) * m


def _fc1_kernel(x_ref, u_ref, v_ref, b_ref, o_ref, t_ref):
    """One (tm, tn) output tile of y = (x @ U) @ V + bias."""
    j = pl.program_id(1)

    # t = x_tile @ U is identical for every N-tile of the same M-tile: compute
    # it once (j == 0) into the persistent VMEM scratch and reuse it afterwards.
    @pl.when(j == 0)
    def _():
        t_ref[...] = jnp.dot(
            x_ref[...], u_ref[...], preferred_element_type=jnp.float32
        )

    # Second low-rank factor, f32 accumulation on the MXU.
    y = jnp.dot(
        t_ref[...].astype(v_ref.dtype), v_ref[...],
        preferred_element_type=jnp.float32,
    )
    # Bias add + output cast in f32 epilogue (safe on v5e: no bf16 VPU needed).
    o_ref[...] = (y + b_ref[...]).astype(o_ref.dtype)


def shared_masked_fc1(x, U, V, bias, *, tm=256, tn=None,
                      compute_dtype=jnp.bfloat16):
    """y = x @ (U @ V) + bias, x: (..., in_features) -> (..., out_features)."""
    in_features, rank = U.shape
    rank_v, out_features = V.shape
    assert rank == rank_v
    assert bias.shape == (out_features,)
    assert x.shape[-1] == in_features

    lead = x.shape[:-1]
    M = math.prod(lead) if lead else 1
    x2 = x.reshape(M, in_features)

    # ---- M tiling: multiple of 8 sublanes (128-multiples preferred for MXU),
    #      pad rows instead of asserting divisibility. ----
    tm = min(tm, _round_up(M, 8))
    Mp = _round_up(M, tm)
    if Mp != M:
        x2 = jnp.pad(x2, ((0, Mp - M), (0, 0)))

    # ---- N tiling: lane-dense (multiple of 128) blocks for large layers,
    #      full-width block otherwise (full dim satisfies the (8,128) rule). ----
    if tn is None:
        if out_features > 512 and out_features % 128 == 0:
            if out_features % 512 == 0:
                tn = 512
            elif out_features % 256 == 0:
                tn = 256
            else:
                tn = 128
        else:
            tn = out_features
    assert out_features % tn == 0

    # bf16 inputs for the MXU (full-rate on v5e/v6e/v7x); f32 accumulate inside.
    x2 = x2.astype(compute_dtype)
    Uc = U.astype(compute_dtype)
    Vc = V.astype(compute_dtype)
    b2 = bias.astype(jnp.float32).reshape(1, out_features)

    grid = (Mp // tm, out_features // tn)

    out = pl.pallas_call(
        _fc1_kernel,
        out_shape=jax.ShapeDtypeStruct((Mp, out_features), x.dtype),
        grid=grid,
        in_specs=[
            # x tile: same block for every N-tile of a row group (no re-DMA).
            pl.BlockSpec((tm, in_features), lambda i, j: (i, 0)),
            # U: whole factor resident in VMEM (in_features x rank, small).
            pl.BlockSpec((in_features, rank), lambda i, j: (0, 0)),
            # V: lane-dense N tile.
            pl.BlockSpec((rank, tn), lambda i, j: (0, j)),
            # bias: (1, tn) block indexed by the N axis, added once per tile.
            pl.BlockSpec((1, tn), lambda i, j: (0, j)),
        ],
        out_specs=pl.BlockSpec((tm, tn), lambda i, j: (i, j)),
        scratch_shapes=[
            # Cached t = x_tile @ U, persists across the (sequential) N axis.
            pltpu.VMEM((tm, rank), jnp.float32),
        ],
        compiler_params=pltpu.CompilerParams(
            # M axis parallel (2-TC sharding on v7x / megacore); N axis must be
            # sequential so j == 0 fills the t cache before j > 0 reuses it.
            dimension_semantics=("parallel", "arbitrary"),
            # Tile sizes above stay well under 32 MiB even double-buffered;
            # explicit limit keeps the budget identical on v5e/v6e/v7x.
            vmem_limit_bytes=32 * 1024 * 1024,
        ),
    )(x2, Uc, Vc, b2)

    if Mp != M:
        out = out[:M]
    return out.reshape(lead + (out_features,))


if __name__ == "__main__":
    # Small shapes consistent with the module:
    #   batch=2, seq=8 -> x: (2, 8, 32); in_features=32, rank=8, out_features=32
    batch, seq = 2, 8
    in_features, rank, out_features = 32, 8, 32

    key = jax.random.PRNGKey(0)
    kx, ku, kv, kb = jax.random.split(key, 4)
    x = jax.random.normal(kx, (batch, seq, in_features), dtype=jnp.float32)
    U = jax.random.normal(ku, (in_features, rank), dtype=jnp.float32) * 0.1
    V = jax.random.normal(kv, (rank, out_features), dtype=jnp.float32) * 0.1
    bias = jax.random.normal(kb, (out_features,), dtype=jnp.float32) * 0.1

    # Reference (plain JAX / PyTorch semantics).
    y_ref = x @ (U @ V) + bias

    # Default bf16-MXU path.
    y = shared_masked_fc1(x, U, V, bias)
    y = jax.block_until_ready(y)
    assert y.shape == (batch, seq, out_features)
    assert jnp.allclose(y, y_ref, atol=2e-2, rtol=2e-2), "bf16 path mismatch"

    # f32 compute path: must match the reference tightly (structural check).
    y32 = shared_masked_fc1(x, U, V, bias, compute_dtype=jnp.float32)
    y32 = jax.block_until_ready(y32)
    assert jnp.allclose(y32, y_ref, atol=1e-5, rtol=1e-5), "f32 path mismatch"

    print("KERNEL_OK")
</pallas_src>

<mosaic_0001>
module attributes {stable_mosaic.version = 11 : i64} {
  func.func @_fc1_kernel(%arg0: i32, %arg1: i32, %arg2: memref<16x32xbf16, #tpu.memory_space<vmem>>, %arg3: memref<32x8xbf16, #tpu.memory_space<vmem>>, %arg4: memref<8x32xbf16, #tpu.memory_space<vmem>>, %arg5: memref<1x32xf32, #tpu.memory_space<vmem>>, %arg6: memref<16x32xf32, #tpu.memory_space<vmem>>, %arg7: memref<16x8xf32, #tpu.memory_space<vmem>>) attributes {dimension_semantics = [#tpu.dimension_semantics<parallel>, #tpu.dimension_semantics<arbitrary>], iteration_bounds = array<i64: 1, 1>, scalar_prefetch = 0 : i64, scratch_operands = 1 : i64, tpu.core_type = #tpu.core_type<tc>, window_params = [{transform_indices = @transform_0, window_bounds = array<i64: 16, 32>}, {pipeline_mode = #tpu.pipeline_mode<synchronous>, transform_indices = @transform_1, window_bounds = array<i64: 32, 8>}, {transform_indices = @transform_2, window_bounds = array<i64: 8, 32>}, {transform_indices = @transform_3, window_bounds = array<i64: 1, 32>}, {transform_indices = @transform_4, window_bounds = array<i64: 16, 32>}]} {
    %c0_i32 = arith.constant 0 : i32
    %0 = arith.cmpi eq, %arg1, %c0_i32 : i32
    %1 = arith.extui %0 : i1 to i32
    %c0_i32_0 = arith.constant 0 : i32
    %2 = arith.cmpi ne, %1, %c0_i32_0 : i32
    scf.if %2 {
      %c0_8 = arith.constant 0 : index
      %c0_9 = arith.constant 0 : index
      %11 = vector.load %arg2[%c0_8, %c0_9] : memref<16x32xbf16, #tpu.memory_space<vmem>>, vector<16x32xbf16>
      %c0_10 = arith.constant 0 : index
      %c0_11 = arith.constant 0 : index
      %12 = vector.load %arg3[%c0_10, %c0_11] : memref<32x8xbf16, #tpu.memory_space<vmem>>, vector<32x8xbf16>
      %cst_12 = arith.constant dense<0.000000e+00> : vector<16x8xf32>
      %13 = tpu.matmul %11, %12, %cst_12 {dimension_numbers = #tpu.dot_dimension_numbers<[1], [0], [0], [1], [0, 0, 1, 1], [], []>} : vector<16x32xbf16>, vector<32x8xbf16>, vector<16x8xf32> -> vector<16x8xf32>
      %c0_13 = arith.constant 0 : index
      %c0_14 = arith.constant 0 : index
      %14 = vector.load %arg7[%c0_13, %c0_14] : memref<16x8xf32, #tpu.memory_space<vmem>>, vector<16x8xf32>
      tpu.vector_store %arg7[%c0_13, %c0_14], %13 {strides = array<i32>} : memref<16x8xf32, #tpu.memory_space<vmem>>, vector<16x8xf32>,
    } else {
    }
    %c0 = arith.constant 0 : index
    %c0_1 = arith.constant 0 : index
    %3 = vector.load %arg7[%c0, %c0_1] : memref<16x8xf32, #tpu.memory_space<vmem>>, vector<16x8xf32>
    %4 = arith.truncf %3 : vector<16x8xf32> to vector<16x8xbf16>
    %c0_2 = arith.constant 0 : index
    %c0_3 = arith.constant 0 : index
    %5 = vector.load %arg4[%c0_2, %c0_3] : memref<8x32xbf16, #tpu.memory_space<vmem>>, vector<8x32xbf16>
    %cst = arith.constant dense<0.000000e+00> : vector<16x32xf32>
    %6 = tpu.matmul %4, %5, %cst {dimension_numbers = #tpu.dot_dimension_numbers<[1], [0], [0], [1], [0, 0, 1, 1], [], []>} : vector<16x8xbf16>, vector<8x32xbf16>, vector<16x32xf32> -> vector<16x32xf32>
    %c0_4 = arith.constant 0 : index
    %c0_5 = arith.constant 0 : index
    %7 = vector.load %arg5[%c0_4, %c0_5] : memref<1x32xf32, #tpu.memory_space<vmem>>, vector<1x32xf32>
    %8 = vector.broadcast %7 : vector<1x32xf32> to vector<16x32xf32>
    %9 = arith.addf %6, %8 : vector<16x32xf32>
    %c0_6 = arith.constant 0 : index
    %c0_7 = arith.constant 0 : index
    %10 = vector.load %arg6[%c0_6, %c0_7] : memref<16x32xf32, #tpu.memory_space<vmem>>, vector<16x32xf32>
    tpu.vector_store %arg6[%c0_6, %c0_7], %9 {strides = array<i32>} : memref<16x32xf32, #tpu.memory_space<vmem>>, vector<16x32xf32>,
    return
  }
  func.func @transform_0(%arg0: i32, %arg1: i32) -> (i32, i32) {
    %c0_i32 = arith.constant 0 : i32
    %c0_i32_0 = arith.constant 0 : i32
    return %arg0, %c0_i32 : i32, i32
  }
  func.func @transform_1(%arg0: i32, %arg1: i32) -> (i32, i32) {
    %c0_i32 = arith.constant 0 : i32
    %c0_i32_0 = arith.constant 0 : i32
    %c0_i32_1 = arith.constant 0 : i32
    return %c0_i32, %c0_i32_0 : i32, i32
  }
  func.func @transform_2(%arg0: i32, %arg1: i32) -> (i32, i32) {
    %c0_i32 = arith.constant 0 : i32
    %c0_i32_0 = arith.constant 0 : i32
    return %c0_i32, %arg1 : i32, i32
  }
  func.func @transform_3(%arg0: i32, %arg1: i32) -> (i32, i32) {
    %c0_i32 = arith.constant 0 : i32
    %c0_i32_0 = arith.constant 0 : i32
    return %c0_i32, %arg1 : i32, i32
  }
  func.func @transform_4(%arg0: i32, %arg1: i32) -> (i32, i32) {
    %c0_i32 = arith.constant 0 : i32
    return %arg0, %arg1 : i32, i32
  }
}

</mosaic_0001>

<bundles_post_ra>
// kernel: tpu_custom_call.1
= control target key start
LH: loop header
LB: loop body
LE: loop exit
PB: predicated region body
PF: predicated region fallthrough
CT: control target
= control target key end

     0   :  { %v230_v1 = vmov 0.0   ;;  %vm231_vm0 = vmmov 0   ;;  %s290_s0 = inlined_call_operand.vmem [shape: bf16[16,32], index: 0, kind: input, shape index: {}]   ;;  %s291_s1 = inlined_call_operand.vmem [shape: bf16[32,8], index: 1, kind: input, shape index: {}]   ;;  %s292_s2 = inlined_call_operand.vmem [shape: bf16[8,32], index: 2, kind: input, shape index: {}]   ;;  %s293_s3 = inlined_call_operand.vmem [shape: f32[1,32], index: 3, kind: input, shape index: {}]   ;;  %s294_s4 = inlined_call_operand.hbm [shape: f32[16,32], index: 4, kind: output, shape index: {}]  }
   0x1   :  { %v203_v0 = vld [vmem:[%s291_s1] sm:$0xff]   ;;  %184 = vmatprep.subr.bf16.mxu0 %v230_v1  ;;  %192 = vmatprep.subr.bf16.mxu1 %v230_v1  ;;  %v204_v2 = vld [vmem:[%s291_s1 + $0x8] sm:$0xff]  }
   0x2   :  { %185 = vmatpush3.bf16.msra.mxu0 %v203_v0  ;;  %188 = vmatprep.mubr.msk.bf16.mxu0 %vm231_vm0, %v230_v1 }
   0x3   :  { %186 = vmatprep.subr.bf16.mxu0 %v230_v1  ;;  %194 = vmatprep.mubr.msk.bf16.mxu1 %vm231_vm0, %v230_v1 }
   0x4   :  { %9 = vsyncpa [#allocation4], 0  ;;  %v205_v3 = vld [vmem:[%s290_s0] sm:$0xff]   ;;  %vm46_vm1 = vcmask 261120   ;;  %vm109_vm2 = vcmask 1043456   ;;  %vm91_vm3 = vcmask 64512  }
   0x5   :  { %v97_v4 = vld [vmem:[%s292_s2] sm:$0xf]  ;;  %s232_s23 = smov [#allocation3]  }
   0x6   :  { %187 = vmatpush3.bf16.msra.mxu0 %v204_v2  ;;  %v111_v5 = vsel %vm109_vm2, %v97_v4, 0  ;;  %v177_v13 = vld [vmem:[%s293_s3] ss:$0 sm:$0xff]  ;;  %s162_s2 = sshll.u32 %s232_s23, 4  ;;  %s163_s2 = int_to_ptr.vmem [resolvable:$true] %s162_s2 }
   0x7   :  { %193 = vmatpush3.bf16.msra.mxu1 %v111_v5  ;;  %s206_s24 = scalar_lea.vmem %s163_s2, 256  ;;  %p211_p1 = scmp.lt.s32.totalorder %s163_s2, %s163_s2 }
   0x8   :  { %p207_p0 = scmp.ne.s32.totalorder %s163_s2, %s206_s24  ;;  %p212_p2 = scmp.lt.s32.totalorder %s206_s24, %s206_s24 }
   0x9   :  { %189 = vmatmul.mubr.msk.bf16.vlgmr.msra.gmra.mrb[0].mxu0 %vm46_vm1, %v205_v3 }
   0xa   :  { %p213_p3 = por %p212_p2, %p211_p1 }
   0xc   :  { %p214_p4 = pnand %p213_p3, %p207_p0 }
  0xdc   :  { %v84_v6 = vpop.f32.mrb[0].mxu0 }
  0xdd   :  { %92 = vst.msk [vmem:[#allocation2] sm:$0xff] %vm91_vm3, %v84_v6  ;;  %v190_v7 = vpop.f32.mrb[1].mxu0 }
  0xde   :  { %v87_v8 = vpop.f32.mrb[2].mxu0 }
  0xdf   :  { %93 = vst.msk [vmem:[#allocation2 + $0x8] sm:$0xff] %vm91_vm3, %v87_v8  ;;  %v191_v9 = vpop.f32.mrb[3].mxu0 }
  0xe4   :  { %v94_v10 = vld [vmem:[#allocation2] sm:$0xff] }
  0xe6   :  { %v95_v11 = vld [vmem:[#allocation2 + $0x8] sm:$0xff] }
  0xe7   :  { %v96_v12 = vpack.c.bf16 %v95_v11, %v94_v10 }
  0xe9   :  { %195 = vmatmul.mubr.msk.bf16.vlgmr.msra.gmra.mrb[0].mxu1 %vm91_vm3, %v96_v12 }
 0x1bc   :  { %v147_v14 = vpop.f32.mrb[0].mxu1 }
 0x1bd   :  { %v148_v15 = vadd.f32 %v177_v13, %v147_v14  ;;  %v196_v16 = vpop.f32.mrb[1].mxu1 }
 0x1be   :  { %v150_v17 = vpop.f32.mrb[2].mxu1 }
 0x1bf   :  { %155 = vst.msk [vmem:[#allocation3] sm:$0xff] %vm46_vm1, %v148_v15  ;;  %v151_v18 = vadd.f32 %v177_v13, %v150_v17  ;;  %v197_v19 = vpop.f32.mrb[3].mxu1 }
 0x1c1   :  { %156 = vst.msk [vmem:[#allocation3 + $0x8] sm:$0xff] %vm46_vm1, %v151_v18 }
 0x1c2   :  { %217 = shalt.err (!%p214_p4)
}
 0x1c3   :  { %s218_s26 = scalar_lea.hbm %s294_s4, 256 }
 0x1c4   :  { %p219_p5 = scmp.ne.s32.totalorder %s294_s4, %s218_s26  ;;  %p222_p6 = scmp.lt.u32.totalorder %s218_s26, %s294_s4 }
 0x1c6   :  { %p224_p7 = pnand %p222_p6, %p219_p5 }
 0x1c8   :  { %227 = shalt.err (!%p224_p7)
}
 0x1c9   :  { %s233_s5 = smov 128   ;;  %s234_s6 = smov 8  }
 0x1ca   :  { %168 = dma.vmem_to_hbm [thread:$0]  %s163_s2, 256, %s294_s4, [#allocation4], %s233_s5, %s233_s5, %s234_s6  }
 0x1cb   :  { %228 = dma.done.wait [#allocation4], 256  }
 0x1cc   :  { %229 = vsyncadd [#allocation4], 4294967040 }
 0x1cd   :  { %172 = vsyncpa [#allocation4], 1 }

</bundles_post_ra>
